<compile_context>
chip_gen: v7x
topology: tpu7x:2x2x1
jax: 0.10.0
libtpu: 0.0.40
codegen_flags: <defaults>
</compile_context>

<pallas_src>
import functools

import jax
import jax.numpy as jnp
from jax.experimental import pallas as pl
from jax.experimental.pallas import tpu as pltpu


def _lstm_mlp_kernel(x_ref, wih_ref, whh_ref, b_ref,
                     w1_ref, b1_ref, w2_ref, b2_ref, out_ref, *, seq_len):
    """Single-invocation kernel: full LSTM recurrence + MLP head on last hidden state.

    x_ref   : (T*Bp, I)  f32   time-major, batch-padded, flattened input
    wih_ref : (I, 4H)    f32   W_ih^T   (PyTorch gate order i, f, g, o)
    whh_ref : (H, 4H)    f32   W_hh^T
    b_ref   : (1, 4H)    f32   b_ih + b_hh
    w1_ref  : (H, Lp)    f32   fc1 weight^T, lane-padded to Lp = 128
    b1_ref  : (1, Lp)    f32   fc1 bias, lane-padded
    w2_ref  : (Lp, Lp)   f32   fc2 weight^T, padded (only [:H, :O] meaningful)
    b2_ref  : (1, Lp)    f32   fc2 bias, lane-padded
    out_ref : (Bp, Lp)   f32   lane-dense output block
    """
    TB, _ = x_ref.shape
    Bp = TB // seq_len
    H = whh_ref.shape[0]

    whh = whh_ref[...]

    # Hoisted input projection: one big MXU matmul over all timesteps at once.
    # Removes x@W_ih and the bias add from the serial per-step dependency chain.
    xz = (jnp.dot(x_ref[...], wih_ref[...], preferred_element_type=jnp.float32)
          + b_ref[...])                                               # (T*Bp, 4H)

    h = jnp.zeros((Bp, H), jnp.float32)
    c = jnp.zeros((Bp, H), jnp.float32)

    # Fully unrolled recurrence (seq_len is static and small): every slice below is
    # static and sublane-aligned (Bp is a multiple of 8).
    for t in range(seq_len):
        z = xz[t * Bp:(t + 1) * Bp, :] + jnp.dot(
            h, whh, preferred_element_type=jnp.float32)               # (Bp, 4H)
        # Two full-vreg EUP passes instead of four 32-lane sliced activations.
        sig_z = jax.nn.sigmoid(z)
        tanh_z = jnp.tanh(z)
        i_g = sig_z[:, 0 * H:1 * H]
        f_g = sig_z[:, 1 * H:2 * H]
        g_g = tanh_z[:, 2 * H:3 * H]
        o_g = sig_z[:, 3 * H:4 * H]
        c = f_g * c + i_g * g_g
        h = o_g * jnp.tanh(c)

    # MLP head: fc1 -> relu -> fc2 on the last timestep's hidden state.
    # Everything is lane-padded to 128, so these are full-width, unmasked ops and
    # the padded-lane contributions are exactly zero (zero weights, zero biases).
    y = jnp.dot(h, w1_ref[...], preferred_element_type=jnp.float32) + b1_ref[...]
    y = jnp.maximum(y, 0.0)
    out_ref[...] = (jnp.dot(y, w2_ref[...], preferred_element_type=jnp.float32)
                    + b2_ref[...])                                    # lane-dense store


def lstm_timeseries_forward(x, params):
    """x: (B, T, input_size) float32  ->  (B, output_size) float32"""
    B, T, I = x.shape
    H = params["w_hh_t"].shape[0]
    O = params["w2_t"].shape[1]

    Bp = max(8, ((B + 7) // 8) * 8)     # pad batch to a full sublane group
    Lp = 128                            # lane-dense head width / output store

    x = x.astype(jnp.float32)
    x_pad = jnp.zeros((Bp, T, I), jnp.float32).at[:B].set(x)
    # Time-major + flatten so the kernel's per-step window is a static,
    # sublane-aligned (Bp, I) slab of one contiguous (T*Bp, I) array.
    x_tm = jnp.transpose(x_pad, (1, 0, 2)).reshape(T * Bp, I)

    # Lane-pad the whole MLP head so fc1 -> relu -> fc2 and the final store are
    # unmasked 128-lane ops.  Padded columns of fc1 are zero (weights + bias), so
    # after ReLU they stay zero; padded rows of fc2 therefore contribute nothing.
    w1p = jnp.zeros((H, Lp), jnp.float32).at[:, :H].set(params["w1_t"])
    b1p = jnp.zeros((1, Lp), jnp.float32).at[:, :H].set(params["b1"])
    w2p = jnp.zeros((Lp, Lp), jnp.float32).at[:H, :O].set(params["w2_t"])
    b2p = jnp.zeros((1, Lp), jnp.float32).at[:, :O].set(params["b2"])

    flops = (2 * T * Bp * I * 4 * H          # hoisted input projection
             + 2 * T * Bp * H * 4 * H        # recurrent h @ W_hh matmuls
             + 2 * Bp * H * Lp               # fc1 (padded)
             + 2 * Bp * Lp * Lp)             # fc2 (padded)
    transcendentals = T * Bp * (2 * 4 * H + H)   # sigmoid(z), tanh(z), tanh(c)
    bytes_accessed = 4 * (x_tm.size
                          + params["w_ih_t"].size + params["w_hh_t"].size
                          + params["b_lstm"].size
                          + w1p.size + b1p.size + w2p.size + b2p.size
                          + Bp * Lp)

    vmem_spec = pl.BlockSpec(memory_space=pltpu.MemorySpace.VMEM)
    out = pl.pallas_call(
        functools.partial(_lstm_mlp_kernel, seq_len=T),
        out_shape=jax.ShapeDtypeStruct((Bp, Lp), jnp.float32),
        in_specs=[vmem_spec] * 8,
        out_specs=vmem_spec,
        cost_estimate=pl.CostEstimate(
            flops=flops,
            transcendentals=transcendentals,
            bytes_accessed=bytes_accessed),
    )(x_tm,
      params["w_ih_t"], params["w_hh_t"], params["b_lstm"],
      w1p, b1p, w2p, b2p)

    return out[:B, :O]


def reference_forward(x, params):
    """Pure-JAX reference identical to the PyTorch module semantics."""
    B, T, I = x.shape
    H = params["w_hh_t"].shape[0]
    h = jnp.zeros((B, H), jnp.float32)
    c = jnp.zeros((B, H), jnp.float32)
    for t in range(T):
        z = x[:, t, :] @ params["w_ih_t"] + h @ params["w_hh_t"] + params["b_lstm"]
        i_g = jax.nn.sigmoid(z[:, 0 * H:1 * H])
        f_g = jax.nn.sigmoid(z[:, 1 * H:2 * H])
        g_g = jnp.tanh(z[:, 2 * H:3 * H])
        o_g = jax.nn.sigmoid(z[:, 3 * H:4 * H])
        c = f_g * c + i_g * g_g
        h = o_g * jnp.tanh(c)
    y = jnp.maximum(h @ params["w1_t"] + params["b1"], 0.0)
    return y @ params["w2_t"] + params["b2"]


def init_params(key, input_size, hidden_size, output_size):
    """Deterministic init mirroring PyTorch's uniform(-1/sqrt(H), 1/sqrt(H)) style."""
    ks = jax.random.split(key, 8)
    s = 1.0 / jnp.sqrt(hidden_size)

    def u(k, shape):
        return jax.random.uniform(k, shape, jnp.float32, -s, s)

    # PyTorch LSTM weights: weight_ih (4H, I), weight_hh (4H, H). Stored transposed.
    w_ih = u(ks[0], (4 * hidden_size, input_size))
    w_hh = u(ks[1], (4 * hidden_size, hidden_size))
    b_ih = u(ks[2], (4 * hidden_size,))
    b_hh = u(ks[3], (4 * hidden_size,))
    # fc1: (H, H), fc2: (O, H). Stored transposed.
    w1 = u(ks[4], (hidden_size, hidden_size))
    b1 = u(ks[5], (hidden_size,))
    w2 = u(ks[6], (output_size, hidden_size))
    b2 = u(ks[7], (output_size,))

    return {
        "w_ih_t": w_ih.T,                                   # (I, 4H)
        "w_hh_t": w_hh.T,                                   # (H, 4H)
        "b_lstm": (b_ih + b_hh).reshape(1, 4 * hidden_size),
        "w1_t": w1.T,                                       # (H, H)
        "b1": b1.reshape(1, hidden_size),
        "w2_t": w2.T,                                       # (H, O)
        "b2": b2.reshape(1, output_size),
    }


if __name__ == "__main__":
    B, T = 2, 8
    input_size, hidden_size, output_size = 8, 32, 4

    key = jax.random.PRNGKey(0)
    k_x, k_p = jax.random.split(key)
    x = jax.random.normal(k_x, (B, T, input_size), jnp.float32)
    params = init_params(k_p, input_size, hidden_size, output_size)

    out = lstm_timeseries_forward(x, params)
    out = jax.block_until_ready(out)

    ref = reference_forward(x, params)
    assert out.shape == (B, output_size)
    assert jnp.allclose(out, ref, rtol=1e-5, atol=1e-5), (out, ref)
    print("KERNEL_OK")
</pallas_src>

<mosaic_0001>
module attributes {stable_mosaic.version = 11 : i64} {
  func.func @_lstm_mlp_kernel(%arg0: memref<64x8xf32, #tpu.memory_space<vmem>>, %arg1: memref<8x128xf32, #tpu.memory_space<vmem>>, %arg2: memref<32x128xf32, #tpu.memory_space<vmem>>, %arg3: memref<1x128xf32, #tpu.memory_space<vmem>>, %arg4: memref<32x128xf32, #tpu.memory_space<vmem>>, %arg5: memref<1x128xf32, #tpu.memory_space<vmem>>, %arg6: memref<128x128xf32, #tpu.memory_space<vmem>>, %arg7: memref<1x128xf32, #tpu.memory_space<vmem>>, %arg8: memref<8x128xf32, #tpu.memory_space<vmem>>) attributes {dimension_semantics = [], scalar_prefetch = 0 : i64, scratch_operands = 0 : i64, tpu.core_type = #tpu.core_type<tc>} {
    %c0 = arith.constant 0 : index
    %c0_0 = arith.constant 0 : index
    %0 = vector.load %arg2[%c0, %c0_0] : memref<32x128xf32, #tpu.memory_space<vmem>>, vector<32x128xf32>
    %c0_1 = arith.constant 0 : index
    %c0_2 = arith.constant 0 : index
    %1 = vector.load %arg0[%c0_1, %c0_2] : memref<64x8xf32, #tpu.memory_space<vmem>>, vector<64x8xf32>
    %c0_3 = arith.constant 0 : index
    %c0_4 = arith.constant 0 : index
    %2 = vector.load %arg1[%c0_3, %c0_4] : memref<8x128xf32, #tpu.memory_space<vmem>>, vector<8x128xf32>
    %cst = arith.constant dense<0.000000e+00> : vector<64x128xf32>
    %3 = tpu.matmul %1, %2, %cst {dimension_numbers = #tpu.dot_dimension_numbers<[1], [0], [0], [1], [0, 0, 1, 1], [], []>} : vector<64x8xf32>, vector<8x128xf32>, vector<64x128xf32> -> vector<64x128xf32>
    %c0_5 = arith.constant 0 : index
    %c0_6 = arith.constant 0 : index
    %4 = vector.load %arg3[%c0_5, %c0_6] : memref<1x128xf32, #tpu.memory_space<vmem>>, vector<1x128xf32>
    %5 = vector.broadcast %4 : vector<1x128xf32> to vector<64x128xf32>
    %6 = arith.addf %3, %5 : vector<64x128xf32>
    %cst_7 = arith.constant 0.000000e+00 : f32
    %7 = vector.broadcast %cst_7 : f32 to vector<8x32xf32>
    %cst_8 = arith.constant 0.000000e+00 : f32
    %8 = vector.broadcast %cst_8 : f32 to vector<8x32xf32>
    %9 = vector.extract_strided_slice %6 {offsets = [0, 0], sizes = [8, 128], strides = [1, 1]} : vector<64x128xf32> to vector<8x128xf32>
    %cst_9 = arith.constant dense<0.000000e+00> : vector<8x128xf32>
    %10 = tpu.matmul %7, %0, %cst_9 {dimension_numbers = #tpu.dot_dimension_numbers<[1], [0], [0], [1], [0, 0, 1, 1], [], []>} : vector<8x32xf32>, vector<32x128xf32>, vector<8x128xf32> -> vector<8x128xf32>
    %11 = arith.addf %9, %10 : vector<8x128xf32>
    %12 = arith.negf %11 : vector<8x128xf32>
    %13 = math.exp %12 : vector<8x128xf32>
    %cst_10 = arith.constant 1.000000e+00 : f32
    %14 = vector.broadcast %cst_10 : f32 to vector<8x128xf32>
    %15 = arith.addf %14, %13 : vector<8x128xf32>
    %16 = arith.divf %14, %15 : vector<8x128xf32>
    %17 = math.tanh %11 : vector<8x128xf32>
    %18 = vector.extract_strided_slice %16 {offsets = [0, 0], sizes = [8, 32], strides = [1, 1]} : vector<8x128xf32> to vector<8x32xf32>
    %19 = vector.extract_strided_slice %16 {offsets = [0, 32], sizes = [8, 32], strides = [1, 1]} : vector<8x128xf32> to vector<8x32xf32>
    %20 = vector.extract_strided_slice %17 {offsets = [0, 64], sizes = [8, 32], strides = [1, 1]} : vector<8x128xf32> to vector<8x32xf32>
    %21 = vector.extract_strided_slice %16 {offsets = [0, 96], sizes = [8, 32], strides = [1, 1]} : vector<8x128xf32> to vector<8x32xf32>
    %22 = arith.mulf %19, %8 : vector<8x32xf32>
    %23 = arith.mulf %18, %20 : vector<8x32xf32>
    %24 = arith.addf %22, %23 : vector<8x32xf32>
    %25 = math.tanh %24 : vector<8x32xf32>
    %26 = arith.mulf %21, %25 : vector<8x32xf32>
    %27 = vector.extract_strided_slice %6 {offsets = [8, 0], sizes = [8, 128], strides = [1, 1]} : vector<64x128xf32> to vector<8x128xf32>
    %cst_11 = arith.constant dense<0.000000e+00> : vector<8x128xf32>
    %28 = tpu.matmul %26, %0, %cst_11 {dimension_numbers = #tpu.dot_dimension_numbers<[1], [0], [0], [1], [0, 0, 1, 1], [], []>} : vector<8x32xf32>, vector<32x128xf32>, vector<8x128xf32> -> vector<8x128xf32>
    %29 = arith.addf %27, %28 : vector<8x128xf32>
    %30 = arith.negf %29 : vector<8x128xf32>
    %31 = math.exp %30 : vector<8x128xf32>
    %cst_12 = arith.constant 1.000000e+00 : f32
    %32 = vector.broadcast %cst_12 : f32 to vector<8x128xf32>
    %33 = arith.addf %32, %31 : vector<8x128xf32>
    %34 = arith.divf %32, %33 : vector<8x128xf32>
    %35 = math.tanh %29 : vector<8x128xf32>
    %36 = vector.extract_strided_slice %34 {offsets = [0, 0], sizes = [8, 32], strides = [1, 1]} : vector<8x128xf32> to vector<8x32xf32>
    %37 = vector.extract_strided_slice %34 {offsets = [0, 32], sizes = [8, 32], strides = [1, 1]} : vector<8x128xf32> to vector<8x32xf32>
    %38 = vector.extract_strided_slice %35 {offsets = [0, 64], sizes = [8, 32], strides = [1, 1]} : vector<8x128xf32> to vector<8x32xf32>
    %39 = vector.extract_strided_slice %34 {offsets = [0, 96], sizes = [8, 32], strides = [1, 1]} : vector<8x128xf32> to vector<8x32xf32>
    %40 = arith.mulf %37, %24 : vector<8x32xf32>
    %41 = arith.mulf %36, %38 : vector<8x32xf32>
    %42 = arith.addf %40, %41 : vector<8x32xf32>
    %43 = math.tanh %42 : vector<8x32xf32>
    %44 = arith.mulf %39, %43 : vector<8x32xf32>
    %45 = vector.extract_strided_slice %6 {offsets = [16, 0], sizes = [8, 128], strides = [1, 1]} : vector<64x128xf32> to vector<8x128xf32>
    %cst_13 = arith.constant dense<0.000000e+00> : vector<8x128xf32>
    %46 = tpu.matmul %44, %0, %cst_13 {dimension_numbers = #tpu.dot_dimension_numbers<[1], [0], [0], [1], [0, 0, 1, 1], [], []>} : vector<8x32xf32>, vector<32x128xf32>, vector<8x128xf32> -> vector<8x128xf32>
    %47 = arith.addf %45, %46 : vector<8x128xf32>
    %48 = arith.negf %47 : vector<8x128xf32>
    %49 = math.exp %48 : vector<8x128xf32>
    %cst_14 = arith.constant 1.000000e+00 : f32
    %50 = vector.broadcast %cst_14 : f32 to vector<8x128xf32>
    %51 = arith.addf %50, %49 : vector<8x128xf32>
    %52 = arith.divf %50, %51 : vector<8x128xf32>
    %53 = math.tanh %47 : vector<8x128xf32>
    %54 = vector.extract_strided_slice %52 {offsets = [0, 0], sizes = [8, 32], strides = [1, 1]} : vector<8x128xf32> to vector<8x32xf32>
    %55 = vector.extract_strided_slice %52 {offsets = [0, 32], sizes = [8, 32], strides = [1, 1]} : vector<8x128xf32> to vector<8x32xf32>
    %56 = vector.extract_strided_slice %53 {offsets = [0, 64], sizes = [8, 32], strides = [1, 1]} : vector<8x128xf32> to vector<8x32xf32>
    %57 = vector.extract_strided_slice %52 {offsets = [0, 96], sizes = [8, 32], strides = [1, 1]} : vector<8x128xf32> to vector<8x32xf32>
    %58 = arith.mulf %55, %42 : vector<8x32xf32>
    %59 = arith.mulf %54, %56 : vector<8x32xf32>
    %60 = arith.addf %58, %59 : vector<8x32xf32>
    %61 = math.tanh %60 : vector<8x32xf32>
    %62 = arith.mulf %57, %61 : vector<8x32xf32>
    %63 = vector.extract_strided_slice %6 {offsets = [24, 0], sizes = [8, 128], strides = [1, 1]} : vector<64x128xf32> to vector<8x128xf32>
    %cst_15 = arith.constant dense<0.000000e+00> : vector<8x128xf32>
    %64 = tpu.matmul %62, %0, %cst_15 {dimension_numbers = #tpu.dot_dimension_numbers<[1], [0], [0], [1], [0, 0, 1, 1], [], []>} : vector<8x32xf32>, vector<32x128xf32>, vector<8x128xf32> -> vector<8x128xf32>
    %65 = arith.addf %63, %64 : vector<8x128xf32>
    %66 = arith.negf %65 : vector<8x128xf32>
    %67 = math.exp %66 : vector<8x128xf32>
    %cst_16 = arith.constant 1.000000e+00 : f32
    %68 = vector.broadcast %cst_16 : f32 to vector<8x128xf32>
    %69 = arith.addf %68, %67 : vector<8x128xf32>
    %70 = arith.divf %68, %69 : vector<8x128xf32>
    %71 = math.tanh %65 : vector<8x128xf32>
    %72 = vector.extract_strided_slice %70 {offsets = [0, 0], sizes = [8, 32], strides = [1, 1]} : vector<8x128xf32> to vector<8x32xf32>
    %73 = vector.extract_strided_slice %70 {offsets = [0, 32], sizes = [8, 32], strides = [1, 1]} : vector<8x128xf32> to vector<8x32xf32>
    %74 = vector.extract_strided_slice %71 {offsets = [0, 64], sizes = [8, 32], strides = [1, 1]} : vector<8x128xf32> to vector<8x32xf32>
    %75 = vector.extract_strided_slice %70 {offsets = [0, 96], sizes = [8, 32], strides = [1, 1]} : vector<8x128xf32> to vector<8x32xf32>
    %76 = arith.mulf %73, %60 : vector<8x32xf32>
    %77 = arith.mulf %72, %74 : vector<8x32xf32>
    %78 = arith.addf %76, %77 : vector<8x32xf32>
    %79 = math.tanh %78 : vector<8x32xf32>
    %80 = arith.mulf %75, %79 : vector<8x32xf32>
    %81 = vector.extract_strided_slice %6 {offsets = [32, 0], sizes = [8, 128], strides = [1, 1]} : vector<64x128xf32> to vector<8x128xf32>
    %cst_17 = arith.constant dense<0.000000e+00> : vector<8x128xf32>
    %82 = tpu.matmul %80, %0, %cst_17 {dimension_numbers = #tpu.dot_dimension_numbers<[1], [0], [0], [1], [0, 0, 1, 1], [], []>} : vector<8x32xf32>, vector<32x128xf32>, vector<8x128xf32> -> vector<8x128xf32>
    %83 = arith.addf %81, %82 : vector<8x128xf32>
    %84 = arith.negf %83 : vector<8x128xf32>
    %85 = math.exp %84 : vector<8x128xf32>
    %cst_18 = arith.constant 1.000000e+00 : f32
    %86 = vector.broadcast %cst_18 : f32 to vector<8x128xf32>
    %87 = arith.addf %86, %85 : vector<8x128xf32>
    %88 = arith.divf %86, %87 : vector<8x128xf32>
    %89 = math.tanh %83 : vector<8x128xf32>
    %90 = vector.extract_strided_slice %88 {offsets = [0, 0], sizes = [8, 32], strides = [1, 1]} : vector<8x128xf32> to vector<8x32xf32>
    %91 = vector.extract_strided_slice %88 {offsets = [0, 32], sizes = [8, 32], strides = [1, 1]} : vector<8x128xf32> to vector<8x32xf32>
    %92 = vector.extract_strided_slice %89 {offsets = [0, 64], sizes = [8, 32], strides = [1, 1]} : vector<8x128xf32> to vector<8x32xf32>
    %93 = vector.extract_strided_slice %88 {offsets = [0, 96], sizes = [8, 32], strides = [1, 1]} : vector<8x128xf32> to vector<8x32xf32>
    %94 = arith.mulf %91, %78 : vector<8x32xf32>
    %95 = arith.mulf %90, %92 : vector<8x32xf32>
    %96 = arith.addf %94, %95 : vector<8x32xf32>
    %97 = math.tanh %96 : vector<8x32xf32>
    %98 = arith.mulf %93, %97 : vector<8x32xf32>
    %99 = vector.extract_strided_slice %6 {offsets = [40, 0], sizes = [8, 128], strides = [1, 1]} : vector<64x128xf32> to vector<8x128xf32>
    %cst_19 = arith.constant dense<0.000000e+00> : vector<8x128xf32>
    %100 = tpu.matmul %98, %0, %cst_19 {dimension_numbers = #tpu.dot_dimension_numbers<[1], [0], [0], [1], [0, 0, 1, 1], [], []>} : vector<8x32xf32>, vector<32x128xf32>, vector<8x128xf32> -> vector<8x128xf32>
    %101 = arith.addf %99, %100 : vector<8x128xf32>
    %102 = arith.negf %101 : vector<8x128xf32>
    %103 = math.exp %102 : vector<8x128xf32>
    %cst_20 = arith.constant 1.000000e+00 : f32
    %104 = vector.broadcast %cst_20 : f32 to vector<8x128xf32>
    %105 = arith.addf %104, %103 : vector<8x128xf32>
    %106 = arith.divf %104, %105 : vector<8x128xf32>
    %107 = math.tanh %101 : vector<8x128xf32>
    %108 = vector.extract_strided_slice %106 {offsets = [0, 0], sizes = [8, 32], strides = [1, 1]} : vector<8x128xf32> to vector<8x32xf32>
    %109 = vector.extract_strided_slice %106 {offsets = [0, 32], sizes = [8, 32], strides = [1, 1]} : vector<8x128xf32> to vector<8x32xf32>
    %110 = vector.extract_strided_slice %107 {offsets = [0, 64], sizes = [8, 32], strides = [1, 1]} : vector<8x128xf32> to vector<8x32xf32>
    %111 = vector.extract_strided_slice %106 {offsets = [0, 96], sizes = [8, 32], strides = [1, 1]} : vector<8x128xf32> to vector<8x32xf32>
    %112 = arith.mulf %109, %96 : vector<8x32xf32>
    %113 = arith.mulf %108, %110 : vector<8x32xf32>
    %114 = arith.addf %112, %113 : vector<8x32xf32>
    %115 = math.tanh %114 : vector<8x32xf32>
    %116 = arith.mulf %111, %115 : vector<8x32xf32>
    %117 = vector.extract_strided_slice %6 {offsets = [48, 0], sizes = [8, 128], strides = [1, 1]} : vector<64x128xf32> to vector<8x128xf32>
    %cst_21 = arith.constant dense<0.000000e+00> : vector<8x128xf32>
    %118 = tpu.matmul %116, %0, %cst_21 {dimension_numbers = #tpu.dot_dimension_numbers<[1], [0], [0], [1], [0, 0, 1, 1], [], []>} : vector<8x32xf32>, vector<32x128xf32>, vector<8x128xf32> -> vector<8x128xf32>
    %119 = arith.addf %117, %118 : vector<8x128xf32>
    %120 = arith.negf %119 : vector<8x128xf32>
    %121 = math.exp %120 : vector<8x128xf32>
    %cst_22 = arith.constant 1.000000e+00 : f32
    %122 = vector.broadcast %cst_22 : f32 to vector<8x128xf32>
    %123 = arith.addf %122, %121 : vector<8x128xf32>
    %124 = arith.divf %122, %123 : vector<8x128xf32>
    %125 = math.tanh %119 : vector<8x128xf32>
    %126 = vector.extract_strided_slice %124 {offsets = [0, 0], sizes = [8, 32], strides = [1, 1]} : vector<8x128xf32> to vector<8x32xf32>
    %127 = vector.extract_strided_slice %124 {offsets = [0, 32], sizes = [8, 32], strides = [1, 1]} : vector<8x128xf32> to vector<8x32xf32>
    %128 = vector.extract_strided_slice %125 {offsets = [0, 64], sizes = [8, 32], strides = [1, 1]} : vector<8x128xf32> to vector<8x32xf32>
    %129 = vector.extract_strided_slice %124 {offsets = [0, 96], sizes = [8, 32], strides = [1, 1]} : vector<8x128xf32> to vector<8x32xf32>
    %130 = arith.mulf %127, %114 : vector<8x32xf32>
    %131 = arith.mulf %126, %128 : vector<8x32xf32>
    %132 = arith.addf %130, %131 : vector<8x32xf32>
    %133 = math.tanh %132 : vector<8x32xf32>
    %134 = arith.mulf %129, %133 : vector<8x32xf32>
    %135 = vector.extract_strided_slice %6 {offsets = [56, 0], sizes = [8, 128], strides = [1, 1]} : vector<64x128xf32> to vector<8x128xf32>
    %cst_23 = arith.constant dense<0.000000e+00> : vector<8x128xf32>
    %136 = tpu.matmul %134, %0, %cst_23 {dimension_numbers = #tpu.dot_dimension_numbers<[1], [0], [0], [1], [0, 0, 1, 1], [], []>} : vector<8x32xf32>, vector<32x128xf32>, vector<8x128xf32> -> vector<8x128xf32>
    %137 = arith.addf %135, %136 : vector<8x128xf32>
    %138 = arith.negf %137 : vector<8x128xf32>
    %139 = math.exp %138 : vector<8x128xf32>
    %cst_24 = arith.constant 1.000000e+00 : f32
    %140 = vector.broadcast %cst_24 : f32 to vector<8x128xf32>
    %141 = arith.addf %140, %139 : vector<8x128xf32>
    %142 = arith.divf %140, %141 : vector<8x128xf32>
    %143 = math.tanh %137 : vector<8x128xf32>
    %144 = vector.extract_strided_slice %142 {offsets = [0, 0], sizes = [8, 32], strides = [1, 1]} : vector<8x128xf32> to vector<8x32xf32>
    %145 = vector.extract_strided_slice %142 {offsets = [0, 32], sizes = [8, 32], strides = [1, 1]} : vector<8x128xf32> to vector<8x32xf32>
    %146 = vector.extract_strided_slice %143 {offsets = [0, 64], sizes = [8, 32], strides = [1, 1]} : vector<8x128xf32> to vector<8x32xf32>
    %147 = vector.extract_strided_slice %142 {offsets = [0, 96], sizes = [8, 32], strides = [1, 1]} : vector<8x128xf32> to vector<8x32xf32>
    %148 = arith.mulf %145, %132 : vector<8x32xf32>
    %149 = arith.mulf %144, %146 : vector<8x32xf32>
    %150 = arith.addf %148, %149 : vector<8x32xf32>
    %151 = math.tanh %150 : vector<8x32xf32>
    %152 = arith.mulf %147, %151 : vector<8x32xf32>
    %c0_25 = arith.constant 0 : index
    %c0_26 = arith.constant 0 : index
    %153 = vector.load %arg4[%c0_25, %c0_26] : memref<32x128xf32, #tpu.memory_space<vmem>>, vector<32x128xf32>
    %cst_27 = arith.constant dense<0.000000e+00> : vector<8x128xf32>
    %154 = tpu.matmul %152, %153, %cst_27 {dimension_numbers = #tpu.dot_dimension_numbers<[1], [0], [0], [1], [0, 0, 1, 1], [], []>} : vector<8x32xf32>, vector<32x128xf32>, vector<8x128xf32> -> vector<8x128xf32>
    %c0_28 = arith.constant 0 : index
    %c0_29 = arith.constant 0 : index
    %155 = vector.load %arg5[%c0_28, %c0_29] : memref<1x128xf32, #tpu.memory_space<vmem>>, vector<1x128xf32>
    %156 = vector.broadcast %155 : vector<1x128xf32> to vector<8x128xf32>
    %157 = arith.addf %154, %156 : vector<8x128xf32>
    %cst_30 = arith.constant 0.000000e+00 : f32
    %158 = vector.broadcast %cst_30 : f32 to vector<8x128xf32>
    %159 = arith.maximumf %157, %158 : vector<8x128xf32>
    %c0_31 = arith.constant 0 : index
    %c0_32 = arith.constant 0 : index
    %160 = vector.load %arg6[%c0_31, %c0_32] : memref<128x128xf32, #tpu.memory_space<vmem>>, vector<128x128xf32>
    %cst_33 = arith.constant dense<0.000000e+00> : vector<8x128xf32>
    %161 = tpu.matmul %159, %160, %cst_33 {dimension_numbers = #tpu.dot_dimension_numbers<[1], [0], [0], [1], [0, 0, 1, 1], [], []>} : vector<8x128xf32>, vector<128x128xf32>, vector<8x128xf32> -> vector<8x128xf32>
    %c0_34 = arith.constant 0 : index
    %c0_35 = arith.constant 0 : index
    %162 = vector.load %arg7[%c0_34, %c0_35] : memref<1x128xf32, #tpu.memory_space<vmem>>, vector<1x128xf32>
    %163 = vector.broadcast %162 : vector<1x128xf32> to vector<8x128xf32>
    %164 = arith.addf %161, %163 : vector<8x128xf32>
    %c0_36 = arith.constant 0 : index
    %c0_37 = arith.constant 0 : index
    %165 = vector.load %arg8[%c0_36, %c0_37] : memref<8x128xf32, #tpu.memory_space<vmem>>, vector<8x128xf32>
    tpu.vector_store %arg8[%c0_36, %c0_37], %164 {strides = array<i32>} : memref<8x128xf32, #tpu.memory_space<vmem>>, vector<8x128xf32>,
    return
  }
}

</mosaic_0001>

<bundles_post_ra>
// kernel: tpu_custom_call.1
= control target key start
LH: loop header
LB: loop body
LE: loop exit
PB: predicated region body
PF: predicated region fallthrough
CT: control target
= control target key end

     0   :  { %13 = vsyncpa [#allocation3], 0  ;;  %s1905_s0 = inlined_call_operand.vmem [shape: f32[64,8], index: 0, kind: input, shape index: {}]   ;;  %s1906_s1 = inlined_call_operand.vmem [shape: f32[8,128], index: 1, kind: input, shape index: {}]   ;;  %s1907_s2 = inlined_call_operand.vmem [shape: f32[32,128], index: 2, kind: input, shape index: {}]   ;;  %s1908_s3 = inlined_call_operand.vmem [shape: f32[1,128], index: 3, kind: input, shape index: {}]   ;;  %s1909_s4 = inlined_call_operand.vmem [shape: f32[32,128], index: 4, kind: input, shape index: {}]   ;;  %s1910_s5 = inlined_call_operand.vmem [shape: f32[1,128], index: 5, kind: input, shape index: {}]   ;;  %s1911_s6 = inlined_call_operand.hbm [shape: f32[128,128], index: 6, kind: input, shape index: {}]   ;;  %s1912_s7 = inlined_call_operand.vmem [shape: f32[1,128], index: 7, kind: input, shape index: {}]   ;;  %s1913_s8 = inlined_call_operand.hbm [shape: f32[8,128], index: 8, kind: output, shape index: {}]  }
   0x1   :  { %14 = vsyncpa [#allocation4], 0  ;;  %s1634_s27 = smov [#allocation2]   ;;  %s1586_s9 = scalar_lea.hbm %s1911_s6, 2048 }
   0x2   :  { %s32_s28 = sshll.u32 %s1634_s27, 4  ;;  %p1587_p0 = scmp.ne.s32.totalorder %s1911_s6, %s1586_s9  ;;  %s33_s28 = int_to_ptr.vmem [resolvable:$true] %s32_s28 }
   0x3   :  { %p1590_p1 = scmp.lt.u32.totalorder %s1586_s9, %s1911_s6 }
   0x5   :  { %p1592_p2 = pnand %p1590_p1, %p1587_p0 }
   0x7   :  { %1595 = shalt.err (!%p1592_p2)
}
   0x8   :  { %s1596_s14 = scalar_lea.vmem %s33_s28, 2048  ;;  %p1601_p4 = scmp.lt.s32.totalorder %s33_s28, %s33_s28 }
   0x9   :  { %p1597_p3 = scmp.ne.s32.totalorder %s33_s28, %s1596_s14  ;;  %p1602_p5 = scmp.lt.s32.totalorder %s1596_s14, %s1596_s14 }
   0xb   :  { %p1603_p6 = por %p1602_p5, %p1601_p4 }
   0xd   :  { %p1604_p7 = pnand %p1603_p6, %p1597_p3 }
   0xf   :  { %1607 = shalt.err (!%p1604_p7)
}
  0x10   :  { %s1635_s15 = smov 128   ;;  %s1636_s16 = smov 8  }
  0x11   :  { %38 = dma.hbm_to_vmem [thread:$0]  %s1911_s6, 2048, %s33_s28, [#allocation3], %s1635_s15, %s1635_s15, %s1636_s16  }
  0x12   :  { %1630 = dma.done.wait [#allocation3], 2048  }
  0x13   :  { %1631 = vsyncadd [#allocation3], 4294965248  ;;  %v1637_v0 = vmov 0.0|0.0   ;;  %vm1638_vm0 = vmmov 0   ;;  %v1639_v1 = vmov 0.0   ;;  %vm64_vm1 = vcmask 64512  }
  0x14   :  { %1453 = vmatprep.subr.bf16.mxu1 %v1637_v0  ;;  %1342 = vmatprep.mubr.msk.f32.mxu1 %vm1638_vm0, %v1639_v1  ;;  %v56_v2 = vld [vmem:[%s1906_s1] sm:$0xff]  ;;  %v49_v4 = vld [vmem:[%s1905_s0 + $0x8] sm:$0xff]  ;;  %v50_v7 = vld [vmem:[%s1905_s0 + $0x10] sm:$0xff]  ;;  %s1641_s21 = smov 32   ;;  %vm194_vm2 = vcmask 261120   ;;  %s1642_s9 = smov [#allocation5]  }
  0x15   :  { %v48_v3 = vld [vmem:[%s1905_s0] sm:$0xff]  ;;  %1287 = vmatprep.subr.mxu0 %v56_v2  ;;  %v45_v6 = vld [vmem:[%s1907_s2 + $0x8] sm:$0xff]  ;;  %v46_v9 = vld [vmem:[%s1907_s2 + $0x10] sm:$0xff]  ;;  %s1180_s10 = sshll.u32 %s1642_s9, 4  ;;  %s1181_s10 = int_to_ptr.vmem [resolvable:$true] %s1180_s10 }
  0x16   :  { %1289 = vmatprep.mubr.msk.f32.mxu0 %vm64_vm1, %v48_v3  ;;  %v44_v5 = vld [vmem:[%s1907_s2] sm:$0xff]  ;;  %1288 = vmatpush3.msra.mxu0 %v56_v2  ;;  %v47_v10 = vld [vmem:[%s1907_s2 + $0x18] sm:$0xff]  ;;  %v53_v14 = vld [vmem:[%s1905_s0 + $0x28] sm:$0xff]  ;;  %s1608_s11 = scalar_lea.vmem %s1181_s10, 128  ;;  %p1613_p9 = scmp.lt.s32.totalorder %s1181_s10, %s1181_s10 }
  0x17   :  { %v1722_v8 = vpack.c.bf16 %v45_v6, %v44_v5  ;;  %1290 = vmatmul.mubr.msk.f32.vlgmr.msra.gmra.mrb[0].mxu0 %vm64_vm1, %v49_v4  ;;  %1435 = vmatprep.subr.bf16.mxu0 %v1637_v0  ;;  %v51_v11 = vld [vmem:[%s1905_s0 + $0x18] sm:$0xff]  ;;  %v1737_v12 = vpack.c.bf16 %v47_v10, %v46_v9  ;;  %v52_v13 = vld [vmem:[%s1905_s0 + $0x20] sm:$0xff]  ;;  %v54_v15 = vld [vmem:[%s1905_s0 + $0x30] sm:$0xff]  ;;  %p1609_p8 = scmp.ne.s32.totalorder %s1181_s10, %s1608_s11  ;;  %p1614_p10 = scmp.lt.s32.totalorder %s1608_s11, %s1608_s11 }
  0x18   :  { %1292 = vmatprep.mubr.msk.f32.mxu0 %vm64_vm1, %v50_v7  ;;  %v55_v16 = vld [vmem:[%s1905_s0 + $0x38] sm:$0xff]  ;;  %v1189_v17 = vld [vmem:[%s1908_s3] ss:$0 sm:$0xff]  ;;  %s1640_s3 = smov 64  }
  0x19   :  { %1437 = vmatpush3.bf16.msra.mxu0 %v1722_v8  ;;  %1455 = vmatpush3.bf16.msra.mxu1 %v1722_v8  ;;  %p1615_p11 = por %p1614_p10, %p1613_p9 }
  0x1a   :  { %1438 = vmatprep.subr.bf16.mxu0 %v1637_v0  ;;  %1456 = vmatprep.subr.bf16.mxu1 %v1637_v0 }
  0x1b   :  { %1293 = vmatmul.mubr.msk.f32.gmra.mrb[2].mxu0 %vm64_vm1, %v51_v11  ;;  %p1616_p12 = pnand %p1615_p11, %p1609_p8 }
  0x1c   :  { %1295 = vmatprep.mubr.msk.f32.mxu0 %vm64_vm1, %v52_v13 }
  0x1d   :  { %1440 = vmatpush3.bf16.msra.mxu0 %v1737_v12  ;;  %1458 = vmatpush3.bf16.msra.mxu1 %v1737_v12 }
  0x1e   :  { %1441 = vmatprep.subr.bf16.mxu0 %v1637_v0  ;;  %1465 = vmatprep.subr.bf16.mxu1 %v1637_v0 }
  0x1f   :  { %1296 = vmatmul.mubr.msk.f32.gmra.mrb[4].mxu0 %vm64_vm1, %v53_v14 }
  0x20   :  { %1298 = vmatprep.mubr.msk.f32.mxu0 %vm64_vm1, %v54_v15 }
  0x23   :  { %1299 = vmatmul.mubr.msk.f32.gmra.mrb[6].mxu0 %vm64_vm1, %v55_v16 }
  0x24   :  { %1309 = vmatprep.mubr.msk.f32.mxu0 %vm1638_vm0, %v1639_v1 }
  0x27   :  { %1310 = vmatmul.mubr.f32.vlgmr.msra.gmra.mrb[8].mxu0 %v1639_v1 }
  0x28   :  { %1443 = vmatpush3.bf16.msra.mxu0 %v1722_v8  ;;  %1320 = vmatprep.mubr.msk.f32.mxu0 %vm1638_vm0, %v1639_v1 }
  0x29   :  { %1444 = vmatprep.subr.bf16.mxu0 %v1637_v0 }
  0x2c   :  { %1446 = vmatpush3.bf16.msra.mxu0 %v1737_v12 }
  0x2d   :  { %1447 = vmatprep.subr.bf16.mxu0 %v1637_v0 }
  0xea   :  { %v1291_v18 = vpop.f32.mrb[0].mxu0 }
  0xeb   :  { %v161_v19 = vadd.f32 %v1291_v18, %v1189_v17  ;;  %v155_v20 = vpop.f32.mrb[1].mxu0 }
  0xec   :  { %v156_v33 = vadd.f32 %v1189_v17, %v155_v20 }
  0xee   :  { %v1294_v21 = vpop.f32.mrb[2].mxu0 }
  0xef   :  { %v1775_v22 = vadd.f32 %v1294_v21, %v1189_v17  ;;  %v165_v23 = vpop.f32.mrb[3].mxu0 }
  0xf0   :  { %v1777_v24 = vadd.f32 %v1189_v17, %v165_v23 }
  0xf2   :  { %v1297_v25 = vpop.f32.mrb[4].mxu0 }
  0xf3   :  { %v1779_v26 = vadd.f32 %v1297_v25, %v1189_v17  ;;  %v175_v27 = vpop.f32.mrb[5].mxu0 }
  0xf4   :  { %v1781_v28 = vadd.f32 %v1189_v17, %v175_v27 }
  0xf6   :  { %v1300_v29 = vpop.f32.mrb[6].mxu0 }
  0xf7   :  { %v1783_v30 = vadd.f32 %v1300_v29, %v1189_v17  ;;  %v185_v31 = vpop.f32.mrb[7].mxu0 }
  0xf8   :  { %v1785_v32 = vadd.f32 %v1189_v17, %v185_v31 }
  0xfa   :  { %v264_v34 = vpop.f32.mrb[8].mxu0 }
  0xfb   :  { %v268_v35 = vadd.f32 %v264_v34, %v156_v33  ;;  %v1311_v36 = vpop.f32.mrb[9].mxu0 }
  0xfd   :  { %1522 = vtanh.f32 %v268_v35  ;;  %v1198_v38 = vmul.f32 -1.442695, %v268_v35 }
  0xff   :  { %1524 = vpow2.f32 %v1198_v38 }
 0x107   :  { %v1523_v37 = vpop.eup %1522 }
 0x108   :  { %278 = vrot.lane.b32.xlu0 %v1523_v37, %s1640_s3 }
 0x109   :  { %v1525_v39 = vpop.eup %1524 }
 0x10a   :  { %v272_v40 = vadd.f32 1.0, %v1525_v39 }
 0x10c   :  { %1526 = vrcp.f32 %v272_v40 }
 0x116   :  { %v1527_v41 = vpop.eup %1526 }
 0x117   :  { %v276_v44 = vmul.f32 0.0, %v1527_v41 }
 0x17a   :  { %v279_v42 = vpop.permute.xlu0 %278 }
 0x17b   :  { %v281_v43 = vmul.f32 %v1527_v41, %v279_v42 }
 0x17d   :  { %283 = vrot.lane.b32.xlu0 %v281_v43, %s1641_s21 }
 0x1ef   :  { %v284_v45 = vpop.permute.xlu0 %283 }
 0x1f0   :  { %v286_v46 = vadd.f32 %v284_v45, %v276_v44 }
 0x1f2   :  { %1528 = vtanh.f32 %v286_v46 }
 0x1fc   :  { %v1529_v47 = vpop.eup %1528 }
 0x1fd   :  { %289 = vrot.lane.b32.xlu1 %v1529_v47, %s1640_s3 }
 0x26f   :  { %v290_v48 = vpop.permute.xlu1 %289 }
 0x270   :  { %v292_v49 = vmul.f32 %v1527_v41, %v290_v48 }
 0x272   :  { %294 = vrot.lane.b32.xlu1 %v292_v49, %s1641_s21 }
 0x2e4   :  { %v295_v50 = vpop.permute.xlu1 %294 }
 0x2e5   :  { %1321 = vmatmul.mubr.msk.f32.vlgmr.msra.gmra.mrb[10].mxu0 %vm194_vm2, %v295_v50 }
 0x2e6   :  { %1449 = vmatpush3.bf16.msra.mxu0 %v1722_v8  ;;  %1331 = vmatprep.mubr.msk.f32.mxu0 %vm1638_vm0, %v1639_v1 }
 0x2e7   :  { %1450 = vmatprep.subr.bf16.mxu0 %v1637_v0 }
 0x2ea   :  { %1452 = vmatpush3.bf16.msra.mxu0 %v1737_v12 }
 0x2eb   :  { %1459 = vmatprep.subr.bf16.mxu0 %v1637_v0 }
 0x3b8   :  { %v364_v51 = vpop.f32.mrb[10].mxu0 }
 0x3b9   :  { %v368_v52 = vadd.f32 %v364_v51, %v161_v19  ;;  %v1322_v53 = vpop.f32.mrb[11].mxu0 }
 0x3bb   :  { %1530 = vtanh.f32 %v368_v52  ;;  %v1200_v55 = vmul.f32 -1.442695, %v368_v52 }
 0x3bd   :  { %1532 = vpow2.f32 %v1200_v55 }
 0x3c5   :  { %v1531_v54 = vpop.eup %1530 }
 0x3c6   :  { %378 = vrot.lane.b32.xlu0 %v1531_v54, %s1640_s3 }
 0x3c7   :  { %v1533_v56 = vpop.eup %1532 }
 0x3c8   :  { %v372_v57 = vadd.f32 1.0, %v1533_v56 }
 0x3ca   :  { %1534 = vrcp.f32 %v372_v57 }
 0x3d4   :  { %v1535_v58 = vpop.eup %1534 }
 0x3d5   :  { %v376_v61 = vmul.f32 %v1535_v58, %v286_v46 }
 0x438   :  { %v379_v59 = vpop.permute.xlu0 %378 }
 0x439   :  { %v381_v60 = vmul.f32 %v1535_v58, %v379_v59 }
 0x43b   :  { %383 = vrot.lane.b32.xlu1 %v381_v60, %s1641_s21 }
 0x4ad   :  { %v384_v62 = vpop.permute.xlu1 %383 }
 0x4ae   :  { %v386_v63 = vadd.f32 %v384_v62, %v376_v61 }
 0x4b0   :  { %1536 = vtanh.f32 %v386_v63 }
 0x4ba   :  { %v1537_v2 = vpop.eup %1536 }
 0x4bb   :  { %389 = vrot.lane.b32.xlu0 %v1537_v2, %s1640_s3 }
 0x52d   :  { %v390_v3 = vpop.permute.xlu0 %389 }
 0x52e   :  { %v392_v4 = vmul.f32 %v1535_v58, %v390_v3 }
 0x530   :  { %394 = vrot.lane.b32.xlu1 %v392_v4, %s1641_s21 }
 0x5a2   :  { %v395_v5 = vpop.permute.xlu1 %394 }
 0x5a3   :  { %1332 = vmatmul.mubr.msk.f32.vlgmr.msra.gmra.mrb[12].mxu0 %vm194_vm2, %v395_v5 }
 0x5a4   :  { %1461 = vmatpush3.bf16.msra.mxu0 %v1722_v8  ;;  %1353 = vmatprep.mubr.msk.f32.mxu0 %vm1638_vm0, %v1639_v1 }
 0x5a5   :  { %1462 = vmatprep.subr.bf16.mxu0 %v1637_v0 }
 0x5a8   :  { %1464 = vmatpush3.bf16.msra.mxu0 %v1737_v12 }
 0x5a9   :  { %1471 = vmatprep.subr.bf16.mxu0 %v1637_v0 }
 0x676   :  { %v464_v6 = vpop.f32.mrb[12].mxu0 }
 0x677   :  { %v468_v7 = vadd.f32 %v464_v6, %v1777_v24  ;;  %v1333_v9 = vpop.f32.mrb[13].mxu0 }
 0x679   :  { %1538 = vtanh.f32 %v468_v7  ;;  %v1202_v11 = vmul.f32 -1.442695, %v468_v7 }
 0x67b   :  { %1540 = vpow2.f32 %v1202_v11 }
 0x683   :  { %v1539_v10 = vpop.eup %1538 }
 0x684   :  { %478 = vrot.lane.b32.xlu0 %v1539_v10, %s1640_s3 }
 0x685   :  { %v1541_v13 = vpop.eup %1540 }
 0x686   :  { %v472_v14 = vadd.f32 1.0, %v1541_v13 }
 0x688   :  { %1542 = vrcp.f32 %v472_v14 }
 0x692   :  { %v1543_v15 = vpop.eup %1542 }
 0x693   :  { %v476_v18 = vmul.f32 %v1543_v15, %v386_v63 }
 0x6f6   :  { %v479_v16 = vpop.permute.xlu0 %478 }
 0x6f7   :  { %v481_v17 = vmul.f32 %v1543_v15, %v479_v16 }
 0x6f9   :  { %483 = vrot.lane.b32.xlu1 %v481_v17, %s1641_s21 }
 0x76b   :  { %v484_v19 = vpop.permute.xlu1 %483 }
 0x76c   :  { %v486_v20 = vadd.f32 %v484_v19, %v476_v18 }
 0x76e   :  { %1544 = vtanh.f32 %v486_v20 }
 0x778   :  { %v1545_v21 = vpop.eup %1544 }
 0x779   :  { %489 = vrot.lane.b32.xlu0 %v1545_v21, %s1640_s3 }
 0x7eb   :  { %v490_v23 = vpop.permute.xlu0 %489 }
 0x7ec   :  { %v492_v24 = vmul.f32 %v1543_v15, %v490_v23 }
 0x7ee   :  { %494 = vrot.lane.b32.xlu1 %v492_v24, %s1641_s21 }
 0x860   :  { %v495_v25 = vpop.permute.xlu1 %494 }
 0x861   :  { %1343 = vmatmul.mubr.msk.f32.vlgmr.msra.gmra.mrb[0].mxu1 %vm194_vm2, %v495_v25 }
 0x862   :  { %1467 = vmatpush3.bf16.msra.mxu1 %v1722_v8  ;;  %1364 = vmatprep.mubr.msk.f32.mxu1 %vm1638_vm0, %v1639_v1 }
 0x863   :  { %1468 = vmatprep.subr.bf16.mxu1 %v1637_v0 }
 0x866   :  { %1470 = vmatpush3.bf16.msra.mxu1 %v1737_v12 }
 0x867   :  { %1477 = vmatprep.subr.bf16.mxu1 %v1637_v0 }
 0x934   :  { %v564_v27 = vpop.f32.mrb[0].mxu1 }
 0x935   :  { %v568_v29 = vadd.f32 %v564_v27, %v1775_v22  ;;  %v1344_v31 = vpop.f32.mrb[1].mxu1 }
 0x937   :  { %1546 = vtanh.f32 %v568_v29  ;;  %v1204_v34 = vmul.f32 -1.442695, %v568_v29 }
 0x939   :  { %1548 = vpow2.f32 %v1204_v34 }
 0x941   :  { %v1547_v33 = vpop.eup %1546 }
 0x942   :  { %578 = vrot.lane.b32.xlu0 %v1547_v33, %s1640_s3 }
 0x943   :  { %v1549_v35 = vpop.eup %1548 }
 0x944   :  { %v572_v36 = vadd.f32 1.0, %v1549_v35 }
 0x946   :  { %1550 = vrcp.f32 %v572_v36 }
 0x950   :  { %v1551_v37 = vpop.eup %1550 }
 0x951   :  { %v576_v40 = vmul.f32 %v1551_v37, %v486_v20 }
 0x9b4   :  { %v579_v38 = vpop.permute.xlu0 %578 }
 0x9b5   :  { %v581_v39 = vmul.f32 %v1551_v37, %v579_v38 }
 0x9b7   :  { %583 = vrot.lane.b32.xlu1 %v581_v39, %s1641_s21 }
 0xa29   :  { %v584_v41 = vpop.permute.xlu1 %583 }
 0xa2a   :  { %v586_v42 = vadd.f32 %v584_v41, %v576_v40 }
 0xa2c   :  { %1552 = vtanh.f32 %v586_v42 }
 0xa36   :  { %v1553_v22 = vpop.eup %1552 }
 0xa37   :  { %589 = vrot.lane.b32.xlu0 %v1553_v22, %s1640_s3 }
 0xaa9   :  { %v590_v43 = vpop.permute.xlu0 %589 }
 0xaaa   :  { %v592_v44 = vmul.f32 %v1551_v37, %v590_v43 }
 0xaac   :  { %594 = vrot.lane.b32.xlu1 %v592_v44, %s1641_s21 }
 0xb1e   :  { %v595_v45 = vpop.permute.xlu1 %594 }
 0xb1f   :  { %1354 = vmatmul.mubr.msk.f32.vlgmr.msra.gmra.mrb[14].mxu0 %vm194_vm2, %v595_v45 }
 0xb20   :  { %1473 = vmatpush3.bf16.msra.mxu0 %v1722_v8  ;;  %1375 = vmatprep.mubr.msk.f32.mxu0 %vm1638_vm0, %v1639_v1 }
 0xb21   :  { %1474 = vmatprep.subr.bf16.mxu0 %v1637_v0 }
 0xb24   :  { %1476 = vmatpush3.bf16.msra.mxu0 %v1737_v12 }
 0xb25   :  { %1483 = vmatprep.subr.bf16.mxu0 %v1637_v0 }
 0xbf2   :  { %v664_v46 = vpop.f32.mrb[14].mxu0 }
 0xbf3   :  { %v668_v47 = vadd.f32 %v664_v46, %v1781_v28  ;;  %v1355_v48 = vpop.f32.mrb[15].mxu0 }
 0xbf4   :  { %v994_v48 = vld [vmem:[%s1909_s4 + $0x8] sm:$0xff] }
 0xbf5   :  { %1554 = vtanh.f32 %v668_v47  ;;  %v1206_v50 = vmul.f32 -1.442695, %v668_v47 }
 0xbf7   :  { %1556 = vpow2.f32 %v1206_v50 }
 0xbff   :  { %v1555_v49 = vpop.eup %1554 }
 0xc00   :  { %678 = vrot.lane.b32.xlu0 %v1555_v49, %s1640_s3  ;;  %v995_v49 = vld [vmem:[%s1909_s4 + $0x10] sm:$0xff] }
 0xc01   :  { %v1557_v51 = vpop.eup %1556 }
 0xc02   :  { %v672_v52 = vadd.f32 1.0, %v1557_v51  ;;  %v996_v51 = vld [vmem:[%s1909_s4 + $0x18] sm:$0xff] }
 0xc04   :  { %1558 = vrcp.f32 %v672_v52  ;;  %v1487_v52 = vpack.c.bf16 %v996_v51, %v995_v49 }
 0xc0e   :  { %v1559_v53 = vpop.eup %1558 }
 0xc0f   :  { %v676_v56 = vmul.f32 %v1559_v53, %v586_v42 }
 0xc72   :  { %v679_v54 = vpop.permute.xlu0 %678 }
 0xc73   :  { %v681_v55 = vmul.f32 %v1559_v53, %v679_v54  ;;  %v1080_v54 = vld [vmem:[#allocation2] sm:$0xff] }
 0xc75   :  { %683 = vrot.lane.b32.xlu1 %v681_v55, %s1641_s21  ;;  %v1081_v55 = vld [vmem:[#allocation2 + $0x8] sm:$0xff] }
 0xce7   :  { %v684_v57 = vpop.permute.xlu1 %683 }
 0xce8   :  { %v686_v58 = vadd.f32 %v684_v57, %v676_v56  ;;  %v1082_v56 = vld [vmem:[#allocation2 + $0x10] sm:$0xff]  ;;  %v1490_v57 = vpack.c.bf16 %v1081_v55, %v1080_v54 }
 0xcea   :  { %1560 = vtanh.f32 %v686_v58 }
 0xcf4   :  { %v1561_v28 = vpop.eup %1560 }
 0xcf5   :  { %689 = vrot.lane.b32.xlu0 %v1561_v28, %s1640_s3 }
 0xd67   :  { %v690_v59 = vpop.permute.xlu0 %689 }
 0xd68   :  { %v692_v60 = vmul.f32 %v1559_v53, %v690_v59  ;;  %v1084_v59 = vld [vmem:[#allocation2 + $0x20] sm:$0xff] }
 0xd6a   :  { %694 = vrot.lane.b32.xlu1 %v692_v60, %s1641_s21  ;;  %v1085_v60 = vld [vmem:[#allocation2 + $0x28] sm:$0xff] }
 0xddc   :  { %v695_v61 = vpop.permute.xlu1 %694 }
 0xddd   :  { %1365 = vmatmul.mubr.msk.f32.vlgmr.msra.gmra.mrb[2].mxu1 %vm194_vm2, %v695_v61  ;;  %v1496_v61 = vpack.c.bf16 %v1085_v60, %v1084_v59 }
 0xdde   :  { %1479 = vmatpush3.bf16.msra.mxu1 %v1722_v8  ;;  %1386 = vmatprep.mubr.msk.f32.mxu1 %vm1638_vm0, %v1639_v1 }
 0xddf   :  { %1480 = vmatprep.subr.bf16.mxu1 %v1637_v0 }
 0xde2   :  { %1482 = vmatpush3.bf16.msra.mxu1 %v1737_v12 }
 0xde3   :  { %1489 = vmatprep.subr.bf16.mxu1 %v1637_v0 }
 0xeb0   :  { %v764_v62 = vpop.f32.mrb[2].mxu1 }
 0xeb1   :  { %v768_v63 = vadd.f32 %v764_v62, %v1779_v26  ;;  %v1366_v2 = vpop.f32.mrb[3].mxu1  ;;  %v1086_v62 = vld [vmem:[#allocation2 + $0x30] sm:$0xff] }
 0xeb3   :  { %1562 = vtanh.f32 %v768_v63  ;;  %v1208_v4 = vmul.f32 -1.442695, %v768_v63  ;;  %v1087_v63 = vld [vmem:[#allocation2 + $0x38] sm:$0xff] }
 0xeb5   :  { %1564 = vpow2.f32 %v1208_v4  ;;  %v1499_v4 = vpack.c.bf16 %v1087_v63, %v1086_v62 }
 0xebd   :  { %v1563_v3 = vpop.eup %1562 }
 0xebe   :  { %778 = vrot.lane.b32.xlu0 %v1563_v3, %s1640_s3 }
 0xebf   :  { %v1565_v8 = vpop.eup %1564 }
 0xec0   :  { %v772_v5 = vadd.f32 1.0, %v1565_v8  ;;  %v1088_v8 = vld [vmem:[#allocation2 + $0x40] sm:$0xff] }
 0xec2   :  { %1566 = vrcp.f32 %v772_v5  ;;  %v1089_v5 = vld [vmem:[#allocation2 + $0x48] sm:$0xff] }
 0xecc   :  { %v1567_v6 = vpop.eup %1566 }
 0xecd   :  { %v776_v12 = vmul.f32 %v1567_v6, %v686_v58  ;;  %v1083_v58 = vld [vmem:[#allocation2 + $0x18] sm:$0xff] }
 0xece   :  { %v1493_v28 = vpack.c.bf16 %v1083_v58, %v1082_v56 }
 0xf30   :  { %v779_v7 = vpop.permute.xlu0 %778 }
 0xf31   :  { %v781_v9 = vmul.f32 %v1567_v6, %v779_v7  ;;  %v1090_v7 = vld [vmem:[#allocation2 + $0x50] sm:$0xff] }
 0xf33   :  { %783 = vrot.lane.b32.xlu1 %v781_v9, %s1641_s21  ;;  %v1091_v9 = vld [vmem:[#allocation2 + $0x58] sm:$0xff] }
 0xfa5   :  { %v784_v10 = vpop.permute.xlu1 %783 }
 0xfa6   :  { %v786_v11 = vadd.f32 %v784_v10, %v776_v12  ;;  %v1505_v12 = vpack.c.bf16 %v1091_v9, %v1090_v7  ;;  %v1092_v10 = vld [vmem:[#allocation2 + $0x60] sm:$0xff] }
 0xfa8   :  { %1568 = vtanh.f32 %v786_v11 }
 0xfb2   :  { %v1569_v26 = vpop.eup %1568 }
 0xfb3   :  { %789 = vrot.lane.b32.xlu0 %v1569_v26, %s1640_s3 }
0x1025   :  { %v790_v13 = vpop.permute.xlu0 %789 }
0x1026   :  { %v792_v14 = vmul.f32 %v1567_v6, %v790_v13  ;;  %v1502_v6 = vpack.c.bf16 %v1089_v5, %v1088_v8 }
0x1028   :  { %794 = vrot.lane.b32.xlu1 %v792_v14, %s1641_s21  ;;  %v1094_v14 = vld [vmem:[#allocation2 + $0x70] sm:$0xff] }
0x109a   :  { %v795_v15 = vpop.permute.xlu1 %794 }
0x109b   :  { %1376 = vmatmul.mubr.msk.f32.vlgmr.msra.gmra.mrb[16].mxu0 %vm194_vm2, %v795_v15  ;;  %v1095_v15 = vld [vmem:[#allocation2 + $0x78] sm:$0xff] }
0x109c   :  { %1397 = vmatprep.mubr.msk.f32.mxu0 %vm1638_vm0, %v1639_v1 }
0x116e   :  { %v864_v16 = vpop.f32.mrb[16].mxu0 }
0x116f   :  { %v868_v17 = vadd.f32 %v864_v16, %v1785_v32  ;;  %v1377_v18 = vpop.f32.mrb[17].mxu0  ;;  %v1511_v16 = vpack.c.bf16 %v1095_v15, %v1094_v14 }
0x1171   :  { %1570 = vtanh.f32 %v868_v17  ;;  %v1210_v20 = vmul.f32 -1.442695, %v868_v17  ;;  %v1213_v17 = vld [vmem:[%s1910_s5] ss:$0 sm:$0xff] }
0x1173   :  { %1572 = vpow2.f32 %v1210_v20 }
0x117b   :  { %v1571_v19 = vpop.eup %1570 }
0x117c   :  { %878 = vrot.lane.b32.xlu0 %v1571_v19, %s1640_s3 }
0x117d   :  { %v1573_v21 = vpop.eup %1572 }
0x117e   :  { %v872_v23 = vadd.f32 1.0, %v1573_v21 }
0x1180   :  { %1574 = vrcp.f32 %v872_v23 }
0x118a   :  { %v1575_v24 = vpop.eup %1574 }
0x118b   :  { %v876_v29 = vmul.f32 %v1575_v24, %v786_v11  ;;  %v1093_v11 = vld [vmem:[#allocation2 + $0x68] sm:$0xff] }
0x118c   :  { %v1508_v26 = vpack.c.bf16 %v1093_v11, %v1092_v10 }
0x11ee   :  { %v879_v25 = vpop.permute.xlu0 %878 }
0x11ef   :  { %v881_v27 = vmul.f32 %v1575_v24, %v879_v25 }
0x11f1   :  { %883 = vrot.lane.b32.xlu1 %v881_v27, %s1641_s21 }
0x1263   :  { %v884_v31 = vpop.permute.xlu1 %883 }
0x1264   :  { %v886_v33 = vadd.f32 %v884_v31, %v876_v29 }
0x1266   :  { %1576 = vtanh.f32 %v886_v33 }
0x1270   :  { %v1577_v32 = vpop.eup %1576 }
0x1271   :  { %889 = vrot.lane.b32.xlu0 %v1577_v32, %s1640_s3 }
0x12e3   :  { %v890_v34 = vpop.permute.xlu0 %889 }
0x12e4   :  { %v892_v35 = vmul.f32 %v1575_v24, %v890_v34 }
0x12e6   :  { %894 = vrot.lane.b32.xlu1 %v892_v35, %s1641_s21 }
0x1358   :  { %v895_v36 = vpop.permute.xlu1 %894 }
0x1359   :  { %1387 = vmatmul.mubr.msk.f32.vlgmr.msra.gmra.mrb[4].mxu1 %vm194_vm2, %v895_v36 }
0x135a   :  { %1432 = vmatprep.mubr.msk.f32.mxu1 %vm1638_vm0, %v1639_v1  ;;  %1491 = vmatpush3.bf16.msra.mxu1 %v1490_v57 }
0x135b   :  { %1492 = vmatprep.subr.bf16.mxu1 %v1637_v0 }
0x135e   :  { %1494 = vmatpush3.bf16.msra.mxu1 %v1493_v28 }
0x135f   :  { %1495 = vmatprep.subr.bf16.mxu1 %v1637_v0 }
0x1362   :  { %1497 = vmatpush3.bf16.msra.mxu1 %v1496_v61 }
0x1363   :  { %1498 = vmatprep.subr.bf16.mxu1 %v1637_v0 }
0x1366   :  { %1500 = vmatpush3.bf16.msra.mxu1 %v1499_v4 }
0x1367   :  { %1501 = vmatprep.subr.bf16.mxu1 %v1637_v0 }
0x136a   :  { %1503 = vmatpush3.bf16.msra.mxu1 %v1502_v6 }
0x136b   :  { %1504 = vmatprep.subr.bf16.mxu1 %v1637_v0 }
0x136e   :  { %1506 = vmatpush3.bf16.msra.mxu1 %v1505_v12 }
0x136f   :  { %1507 = vmatprep.subr.bf16.mxu1 %v1637_v0 }
0x1372   :  { %1509 = vmatpush3.bf16.msra.mxu1 %v1508_v26 }
0x1373   :  { %1510 = vmatprep.subr.bf16.mxu1 %v1637_v0 }
0x1376   :  { %1512 = vmatpush3.bf16.msra.mxu1 %v1511_v16 }
0x142c   :  { %v964_v37 = vpop.f32.mrb[4].mxu1 }
0x142d   :  { %v968_v38 = vadd.f32 %v964_v37, %v1783_v30  ;;  %v1388_v39 = vpop.f32.mrb[5].mxu1  ;;  %v993_v30 = vld [vmem:[%s1909_s4] sm:$0xff] }
0x142e   :  { %v1484_v50 = vpack.c.bf16 %v994_v48, %v993_v30 }
0x142f   :  { %1578 = vtanh.f32 %v968_v38  ;;  %v1212_v41 = vmul.f32 -1.442695, %v968_v38 }
0x1430   :  { %1485 = vmatpush3.bf16.msra.mxu0 %v1484_v50 }
0x1431   :  { %1580 = vpow2.f32 %v1212_v41  ;;  %1486 = vmatprep.subr.bf16.mxu0 %v1637_v0  ;;  %v1215_v0 = vld [vmem:[%s1912_s7] ss:$0 sm:$0xff] }
0x1434   :  { %1488 = vmatpush3.bf16.msra.mxu0 %v1487_v52 }
0x1439   :  { %v1579_v40 = vpop.eup %1578 }
0x143a   :  { %978 = vrot.lane.b32.xlu0 %v1579_v40, %s1640_s3 }
0x143b   :  { %v1581_v42 = vpop.eup %1580 }
0x143c   :  { %v972_v22 = vadd.f32 1.0, %v1581_v42 }
0x143e   :  { %1582 = vrcp.f32 %v972_v22 }
0x1448   :  { %v1583_v43 = vpop.eup %1582 }
0x1449   :  { %v976_v46 = vmul.f32 %v1583_v43, %v886_v33 }
0x14ac   :  { %v979_v44 = vpop.permute.xlu0 %978 }
0x14ad   :  { %v981_v45 = vmul.f32 %v1583_v43, %v979_v44 }
0x14af   :  { %983 = vrot.lane.b32.xlu1 %v981_v45, %s1641_s21 }
0x1521   :  { %v984_v1 = vpop.permute.xlu1 %983 }
0x1522   :  { %v986_v47 = vadd.f32 %v984_v1, %v976_v46 }
0x1524   :  { %1584 = vtanh.f32 %v986_v47 }
0x152e   :  { %v1585_v53 = vpop.eup %1584 }
0x152f   :  { %989 = vrot.lane.b32.xlu0 %v1585_v53, %s1640_s3 }
0x15a1   :  { %v990_v2 = vpop.permute.xlu0 %989 }
0x15a2   :  { %v992_v3 = vmul.f32 %v1583_v43, %v990_v2 }
0x15a4   :  { %1005 = vrot.lane.b32.xlu1 %v992_v3, %s1641_s21 }
0x1616   :  { %v1006_v13 = vpop.permute.xlu1 %1005 }
0x1617   :  { %1398 = vmatmul.mubr.msk.f32.vlgmr.msra.gmra.mrb[18].mxu0 %vm194_vm2, %v1006_v13 }
0x16ea   :  { %v1075_v18 = vpop.f32.mrb[18].mxu0 }
0x16eb   :  { %v1076_v19 = vadd.f32 %v1213_v17, %v1075_v18  ;;  %v1399_v20 = vpop.f32.mrb[19].mxu0 }
0x16ed   :  { %v1079_v21 = vmax.f32 %v1076_v19, 0.0 }
0x16ef   :  { %1433 = vmatmul.mubr.f32.vlgmr.msra.gmra.mrb[6].mxu1 %v1079_v21 }
0x17c2   :  { %v1169_v23 = vpop.f32.mrb[6].mxu1 }
0x17c3   :  { %v1170_v24 = vadd.f32 %v1215_v0, %v1169_v23  ;;  %v1434_v25 = vpop.f32.mrb[7].mxu1 }
0x17c5   :  { %1173 = vst [vmem:[#allocation5] sm:$0xff] %v1170_v24 }
0x17c6   :  { %1619 = shalt.err (!%p1616_p12)
}
0x17c7   :  { %s1620_s13 = scalar_lea.hbm %s1913_s8, 128 }
0x17c8   :  { %p1621_p13 = scmp.ne.s32.totalorder %s1913_s8, %s1620_s13  ;;  %p1624_p0 = scmp.lt.u32.totalorder %s1620_s13, %s1913_s8 }
0x17ca   :  { %p1626_p1 = pnand %p1624_p0, %p1621_p13 }
0x17cc   :  { %1629 = shalt.err (!%p1626_p1)
}
0x17cd   :  { %1183 = dma.vmem_to_hbm [thread:$0]  %s1181_s10, 128, %s1913_s8, [#allocation4]  }
0x17ce   :  { %1632 = dma.done.wait [#allocation4], 128  }
0x17cf   :  { %1633 = vsyncadd [#allocation4], 4294967168 }
0x17d0   :  { %1187 = vsyncpa [#allocation3], 1 }
0x17d1   :  { %1188 = vsyncpa [#allocation4], 1 }

</bundles_post_ra>
